<compile_context>
chip_gen: v5e
topology: v5e:2x2
jax: 0.10.0
libtpu: 0.0.40
codegen_flags: <defaults>
</compile_context>

<pallas_src>
import functools
import math

import jax
import jax.numpy as jnp
from jax.experimental import pallas as pl
from jax.experimental.pallas import tpu as pltpu

_INV_SQRT2 = 1.0 / math.sqrt(2.0)


def _round_up(a, b):
    return (a + b - 1) // b * b


def _pick_tile(pref, total, quantum=128):
    """Largest multiple of `quantum` <= max(pref, quantum) that divides `total`."""
    t = min(_round_up(pref, quantum), total)
    while total % t:
        t -= quantum
    return t


def _spec(shape, index_map, buffers=None):
    """BlockSpec with optional explicit buffer count (Buffered(1) for grid-constant blocks)."""
    if buffers is not None:
        try:
            return pl.BlockSpec(shape, index_map, pipeline_mode=pl.Buffered(buffers))
        except Exception:  # older jax without pipeline_mode -> plain (double-buffered) spec
            pass
    return pl.BlockSpec(shape, index_map)


def _vmem_budget_bytes():
    """Generation-aware scoped-VMEM budget: ~3/4 of physical (48 MiB v7x, 96 MiB v5e/v6e)."""
    try:
        cap = int(pltpu.get_tpu_info().vmem_capacity_bytes)
    except Exception:
        cap = 128 * 1024 * 1024
    return (cap * 3) // 4


def _gelu(h, approx):
    if approx:
        # sigmoid form runs on the EUP (separate VLIW slot) instead of a long VALU
        # erf polynomial; ~1e-2 max deviation from torch's exact GELU.
        return h * jax.nn.sigmoid(1.702 * h)
    return 0.5 * h * (1.0 + jax.lax.erf(h * _INV_SQRT2))


# ----------------------------------------------------------------------------- kernels


def _mlp_kernel_ctile(x_ref, w1_ref, b1_ref, w2_ref, b2_ref, o_ref, h_ref,
                      *, cdtype, approx_gelu):
    """Grid (row tile i, Cout tile j). W1 resident; GELU(fc1) cached in VMEM across j."""
    j = pl.program_id(1)

    # fc1 + GELU only once per row tile (first Cout tile); hidden activation is
    # cached in VMEM scratch and reused for every Cout tile.
    @pl.when(j == 0)
    def _():
        x = x_ref[...].astype(cdtype)   # in-kernel cast: no wrapper-side copy of x
        h = jnp.dot(x, w1_ref[...], preferred_element_type=jnp.float32)
        h = _gelu(h + b1_ref[...], approx_gelu)
        h_ref[...] = h.astype(h_ref.dtype)

    # dropout p=0.0 -> identity; fc2 on the current Cout tile
    o = jnp.dot(h_ref[...], w2_ref[...], preferred_element_type=jnp.float32)
    o_ref[...] = (o + b2_ref[...]).astype(o_ref.dtype)


def _mlp_kernel_hstream(x_ref, w1_ref, b1_ref, w2_ref, b2_ref, o_ref, acc_ref,
                        *, cdtype, approx_gelu):
    """Grid (row tile i, hidden chunk k). Streams W1/W2 over H; fc2 accumulated in
    f32 VMEM. VMEM footprint is independent of H (large hidden dims / v7x 64 MiB)."""
    k = pl.program_id(1)

    @pl.when(k == 0)
    def _():
        acc_ref[...] = jnp.zeros_like(acc_ref)

    x = x_ref[...].astype(cdtype)
    h = jnp.dot(x, w1_ref[...], preferred_element_type=jnp.float32)
    h = _gelu(h + b1_ref[...], approx_gelu)
    acc_ref[...] += jnp.dot(h.astype(cdtype), w2_ref[...],
                            preferred_element_type=jnp.float32)

    @pl.when(k == pl.num_programs(1) - 1)
    def _():
        o_ref[...] = (acc_ref[...] + b2_ref[...]).astype(o_ref.dtype)


# ----------------------------------------------------------------------------- wrappers


def prepare_mlp_params(w1, b1, w2, b2, *, compute_dtype=None):
    """Pad channel dims to 128-multiples and cast weights to the compute dtype ONCE.

    Hoist this out of the per-call hot path: every forward then skips the HBM
    round-trip of re-padding / re-casting the weights.
    Returns ((w1p, b1p, w2p, b2p), out_features).
    """
    Cin, H = w1.shape
    H2, Cout = w2.shape
    assert H2 == H and b1.shape == (H,) and b2.shape == (Cout,)
    cdtype = jnp.dtype(w1.dtype if compute_dtype is None else compute_dtype)
    Cin_p, H_p, Cout_p = (_round_up(d, 128) for d in (Cin, H, Cout))

    w1p = w1.astype(cdtype)
    if (Cin_p, H_p) != (Cin, H):
        w1p = jnp.pad(w1p, ((0, Cin_p - Cin), (0, H_p - H)))
    w2p = w2.astype(cdtype)
    if (H_p, Cout_p) != (H, Cout):
        w2p = jnp.pad(w2p, ((0, H_p - H), (0, Cout_p - Cout)))
    b1p = b1.astype(jnp.float32)
    if H_p != H:
        b1p = jnp.pad(b1p, (0, H_p - H))
    b2p = b2.astype(jnp.float32)
    if Cout_p != Cout:
        b2p = jnp.pad(b2p, (0, Cout_p - Cout))
    return (w1p, b1p.reshape(1, H_p), w2p, b2p.reshape(1, Cout_p)), Cout


@functools.partial(jax.jit,
                   static_argnames=("cout", "tm", "tn", "th", "approx_gelu", "hstream"))
def mlp_pallas_prepared(x, w1p, b1p, w2p, b2p, *, cout,
                        tm=256, tn=512, th=512, approx_gelu=False, hstream=None):
    """x: [B, N, Cin] -> [B, N, cout], with pre-padded / pre-cast weights."""
    B, N, Cin = x.shape
    Cin_p, H_p = w1p.shape
    H_p2, Cout_p = w2p.shape
    assert H_p2 == H_p and Cin_p == _round_up(Cin, 128) and Cout_p >= cout

    xdtype = x.dtype
    cdtype = jnp.dtype(w1p.dtype)
    xsize = jnp.dtype(xdtype).itemsize
    csize = cdtype.itemsize
    osize = xsize                        # output kept in the input dtype
    sublane = max(8, 32 // csize)        # 8 for f32, 16 for bf16

    M = B * N
    tm_eff = _round_up(min(tm, _round_up(M, sublane)), sublane)
    # v7x megacore: ensure the "parallel" row axis has >= 2 tiles when M allows,
    # otherwise one of the two TensorCores idles.
    if _round_up(M, tm_eff) // tm_eff < 2 and tm_eff > sublane:
        tm_eff = _round_up(max(sublane, tm_eff // 2), sublane)

    tn_eff = _pick_tile(tn, Cout_p)
    th_eff = _pick_tile(th, H_p)

    budget = _vmem_budget_bytes()
    headroom = 2 * 1024 * 1024           # compiler-internal scratch / semaphores

    # Exact per-path VMEM footprints (reflecting Buffered(1) resident blocks).
    def ctile_vmem(tm_, tn_):
        return (2 * tm_ * Cin_p * xsize              # x row tile (double-buffered)
                + Cin_p * H_p * csize + H_p * 4      # W1 + b1, Buffered(1) resident
                + 2 * (H_p * tn_ * csize + tn_ * 4)  # W2 / b2 Cout tiles
                + 2 * tm_ * tn_ * osize              # output tile
                + tm_ * H_p * csize)                 # cached GELU(fc1) scratch

    def hstream_vmem(tm_, th_):
        return (2 * tm_ * Cin_p * xsize
                + 2 * (Cin_p * th_ * csize + th_ * 4)  # W1 / b1 H-chunks
                + 2 * th_ * Cout_p * csize             # W2 H-chunk
                + Cout_p * 4                           # b2, Buffered(1)
                + 2 * tm_ * Cout_p * osize             # output block
                + tm_ * Cout_p * 4)                    # f32 fc2 accumulator

    if hstream is None:
        # Resident-W1 path only when it actually fits the scoped-VMEM budget.
        hstream = ctile_vmem(tm_eff, tn_eff) > budget - headroom

    if not hstream:
        # Grow the Cout tile toward 1024 on large-VMEM parts (v5e/v6e) if it still fits.
        tn_big = _pick_tile(1024, Cout_p)
        if tn_big > tn_eff and ctile_vmem(tm_eff, tn_big) <= budget - headroom:
            tn_eff = tn_big
        while ctile_vmem(tm_eff, tn_eff) > budget - headroom and tn_eff > 128:
            tn_eff = _pick_tile(tn_eff - 128, Cout_p)
        while ctile_vmem(tm_eff, tn_eff) > budget - headroom and tm_eff > sublane:
            tm_eff = _round_up(max(sublane, tm_eff // 2), sublane)
        vmem_need = ctile_vmem(tm_eff, tn_eff)
    else:
        while hstream_vmem(tm_eff, th_eff) > budget - headroom and th_eff > 128:
            th_eff = _pick_tile(th_eff - 128, H_p)
        while hstream_vmem(tm_eff, th_eff) > budget - headroom and tm_eff > sublane:
            tm_eff = _round_up(max(sublane, tm_eff // 2), sublane)
        vmem_need = hstream_vmem(tm_eff, th_eff)

    Mp = _round_up(M, tm_eff)
    x2d = x.reshape(M, Cin)
    if Mp != M or Cin_p != Cin:          # skip the pad copy entirely when aligned
        x2d = jnp.pad(x2d, ((0, Mp - M), (0, Cin_p - Cin)))

    vmem_limit = int(max(4 * 1024 * 1024, vmem_need + headroom))

    cost = pl.CostEstimate(
        flops=int(2 * M * (Cin_p * H_p + H_p * Cout_p)),
        transcendentals=int(M * H_p),
        bytes_accessed=int(Mp * Cin_p * xsize + Cin_p * H_p * csize
                           + H_p * Cout_p * csize + (H_p + Cout_p) * 4
                           + Mp * Cout_p * osize),
    )

    if not hstream:
        grid = (Mp // tm_eff, Cout_p // tn_eff)
        kernel = functools.partial(_mlp_kernel_ctile, cdtype=cdtype, approx_gelu=approx_gelu)
        in_specs = [
            pl.BlockSpec((tm_eff, Cin_p), lambda i, j: (i, 0)),     # x row tile
            _spec((Cin_p, H_p), lambda i, j: (0, 0), buffers=1),    # W1 resident (single buf)
            _spec((1, H_p), lambda i, j: (0, 0), buffers=1),        # b1 resident (single buf)
            pl.BlockSpec((H_p, tn_eff), lambda i, j: (0, j)),       # W2 Cout tile
            pl.BlockSpec((1, tn_eff), lambda i, j: (0, j)),         # b2 Cout tile
        ]
        out_specs = pl.BlockSpec((tm_eff, tn_eff), lambda i, j: (i, j))
        scratch = [pltpu.VMEM((tm_eff, H_p), cdtype)]               # cached GELU(fc1)
    else:
        grid = (Mp // tm_eff, H_p // th_eff)
        kernel = functools.partial(_mlp_kernel_hstream, cdtype=cdtype, approx_gelu=approx_gelu)
        in_specs = [
            pl.BlockSpec((tm_eff, Cin_p), lambda i, k: (i, 0)),     # x row tile
            pl.BlockSpec((Cin_p, th_eff), lambda i, k: (0, k)),     # W1 H-chunk
            pl.BlockSpec((1, th_eff), lambda i, k: (0, k)),         # b1 H-chunk
            pl.BlockSpec((th_eff, Cout_p), lambda i, k: (k, 0)),    # W2 H-chunk
            _spec((1, Cout_p), lambda i, k: (0, 0), buffers=1),     # b2 resident (single buf)
        ]
        out_specs = pl.BlockSpec((tm_eff, Cout_p), lambda i, k: (i, 0))
        scratch = [pltpu.VMEM((tm_eff, Cout_p), jnp.float32)]       # f32 fc2 accumulator

    out2d = pl.pallas_call(
        kernel,
        out_shape=jax.ShapeDtypeStruct((Mp, Cout_p), xdtype),
        grid_spec=pltpu.PrefetchScalarGridSpec(
            num_scalar_prefetch=0,
            grid=grid,
            in_specs=in_specs,
            out_specs=out_specs,
            scratch_shapes=scratch,
        ),
        compiler_params=pltpu.CompilerParams(
            dimension_semantics=("parallel", "arbitrary"),
            vmem_limit_bytes=vmem_limit,
        ),
        cost_estimate=cost,
    )(x2d, w1p, b1p, w2p, b2p)

    return out2d[:M, :cout].reshape(B, N, cout)


def mlp_pallas(x, w1, b1, w2, b2, *, tm=256, tn=512, th=512,
               compute_dtype=None, approx_gelu=False, hstream=None):
    """Convenience entry: pads/casts weights then runs the kernel.
    For repeated forwards, hoist prepare_mlp_params() and call mlp_pallas_prepared()."""
    params, cout = prepare_mlp_params(w1, b1, w2, b2, compute_dtype=compute_dtype)
    return mlp_pallas_prepared(x, *params, cout=cout, tm=tm, tn=tn, th=th,
                               approx_gelu=approx_gelu, hstream=hstream)


def init_mlp_params(key, in_features, hidden_features, out_features, dtype=jnp.float32):
    """Deterministic init mirroring nn.Linear shapes (weights stored as [in, out])."""
    k1, k2, k3, k4 = jax.random.split(key, 4)
    bound1 = 1.0 / math.sqrt(in_features)
    bound2 = 1.0 / math.sqrt(hidden_features)
    w1 = jax.random.uniform(k1, (in_features, hidden_features), dtype, -bound1, bound1)
    b1 = jax.random.uniform(k2, (hidden_features,), dtype, -bound1, bound1)
    w2 = jax.random.uniform(k3, (hidden_features, out_features), dtype, -bound2, bound2)
    b2 = jax.random.uniform(k4, (out_features,), dtype, -bound2, bound2)
    return w1, b1, w2, b2


if __name__ == "__main__":
    key = jax.random.PRNGKey(0)
    kx, kp = jax.random.split(key)

    B, N = 2, 8            # batch, tokens
    in_features = 32
    hidden_features = 64
    out_features = 32      # out_features defaults to in_features in the module

    x = jax.random.normal(kx, (B, N, in_features), dtype=jnp.float32)
    w1, b1, w2, b2 = init_mlp_params(kp, in_features, hidden_features, out_features)

    # reference in plain JAX (exact GELU, dropout p=0 is identity)
    h_ref = x.reshape(-1, in_features) @ w1 + b1
    h_ref = 0.5 * h_ref * (1.0 + jax.lax.erf(h_ref / jnp.sqrt(2.0)))
    y_ref = (h_ref @ w2 + b2).reshape(B, N, out_features)

    # f32, resident-W1 path — matches torch numerics tightly
    y32 = jax.block_until_ready(mlp_pallas(x, w1, b1, w2, b2))
    assert y32.shape == (B, N, out_features)
    assert jnp.allclose(y32, y_ref, atol=1e-5, rtol=1e-5)

    # bf16 MXU path (f32 accumulation) — the fast path on v5e/v6e/v7x
    ybf = jax.block_until_ready(
        mlp_pallas(x, w1, b1, w2, b2, compute_dtype=jnp.bfloat16))
    assert jnp.allclose(ybf, y_ref, atol=5e-2, rtol=5e-2)

    # H-streaming path (auto-selected for large hidden dims; forced here for coverage)
    yhs = jax.block_until_ready(mlp_pallas(x, w1, b1, w2, b2, hstream=True))
    assert jnp.allclose(yhs, y_ref, atol=1e-5, rtol=1e-5)

    # prepared (pre-padded / pre-cast) weights, hoisted out of the hot loop
    params, cout = prepare_mlp_params(w1, b1, w2, b2, compute_dtype=jnp.bfloat16)
    yprep = jax.block_until_ready(mlp_pallas_prepared(x, *params, cout=cout))
    assert jnp.allclose(yprep, y_ref, atol=5e-2, rtol=5e-2)

    # approximate (EUP) GELU path
    yap = jax.block_until_ready(mlp_pallas(x, w1, b1, w2, b2, approx_gelu=True))
    assert jnp.allclose(yap, y_ref, atol=5e-2, rtol=5e-2)

    print("KERNEL_OK")
</pallas_src>

<mosaic_0001>
module attributes {stable_mosaic.version = 11 : i64} {
  func.func @_mlp_kernel_ctile(%arg0: i32, %arg1: i32, %arg2: memref<8x128xf32, #tpu.memory_space<vmem>>, %arg3: memref<128x128xf32, #tpu.memory_space<vmem>>, %arg4: memref<1x128xf32, #tpu.memory_space<vmem>>, %arg5: memref<128x128xf32, #tpu.memory_space<vmem>>, %arg6: memref<1x128xf32, #tpu.memory_space<vmem>>, %arg7: memref<8x128xf32, #tpu.memory_space<vmem>>, %arg8: memref<8x128xf32, #tpu.memory_space<vmem>>) attributes {dimension_semantics = [#tpu.dimension_semantics<parallel>, #tpu.dimension_semantics<arbitrary>], iteration_bounds = array<i64: 2, 1>, scalar_prefetch = 0 : i64, scratch_operands = 1 : i64, tpu.core_type = #tpu.core_type<tc>, window_params = [{transform_indices = @transform_0, window_bounds = array<i64: 8, 128>}, {pipeline_mode = #tpu.pipeline_mode<synchronous>, transform_indices = @transform_1, window_bounds = array<i64: 128, 128>}, {pipeline_mode = #tpu.pipeline_mode<synchronous>, transform_indices = @transform_2, window_bounds = array<i64: 1, 128>}, {transform_indices = @transform_3, window_bounds = array<i64: 128, 128>}, {transform_indices = @transform_4, window_bounds = array<i64: 1, 128>}, {transform_indices = @transform_5, window_bounds = array<i64: 8, 128>}]} {
    %c0_i32 = arith.constant 0 : i32
    %0 = arith.cmpi eq, %arg1, %c0_i32 : i32
    %1 = arith.extui %0 : i1 to i32
    %c0_i32_0 = arith.constant 0 : i32
    %2 = arith.cmpi ne, %1, %c0_i32_0 : i32
    scf.if %2 {
      %c0_8 = arith.constant 0 : index
      %c0_9 = arith.constant 0 : index
      %10 = vector.load %arg2[%c0_8, %c0_9] : memref<8x128xf32, #tpu.memory_space<vmem>>, vector<8x128xf32>
      %c0_10 = arith.constant 0 : index
      %c0_11 = arith.constant 0 : index
      %11 = vector.load %arg3[%c0_10, %c0_11] : memref<128x128xf32, #tpu.memory_space<vmem>>, vector<128x128xf32>
      %cst_12 = arith.constant dense<0.000000e+00> : vector<8x128xf32>
      %12 = tpu.matmul %10, %11, %cst_12 {dimension_numbers = #tpu.dot_dimension_numbers<[1], [0], [0], [1], [0, 0, 1, 1], [], []>} : vector<8x128xf32>, vector<128x128xf32>, vector<8x128xf32> -> vector<8x128xf32>
      %c0_13 = arith.constant 0 : index
      %c0_14 = arith.constant 0 : index
      %13 = vector.load %arg4[%c0_13, %c0_14] : memref<1x128xf32, #tpu.memory_space<vmem>>, vector<1x128xf32>
      %14 = vector.broadcast %13 : vector<1x128xf32> to vector<8x128xf32>
      %15 = arith.addf %12, %14 : vector<8x128xf32>
      %cst_15 = arith.constant 5.000000e-01 : f32
      %16 = vector.broadcast %cst_15 : f32 to vector<8x128xf32>
      %17 = arith.mulf %16, %15 : vector<8x128xf32>
      %cst_16 = arith.constant 0.707106769 : f32
      %18 = vector.broadcast %cst_16 : f32 to vector<8x128xf32>
      %19 = arith.mulf %15, %18 : vector<8x128xf32>
      %20 = math.erf %19 : vector<8x128xf32>
      %cst_17 = arith.constant 1.000000e+00 : f32
      %21 = vector.broadcast %cst_17 : f32 to vector<8x128xf32>
      %22 = arith.addf %21, %20 : vector<8x128xf32>
      %23 = arith.mulf %17, %22 : vector<8x128xf32>
      %c0_18 = arith.constant 0 : index
      %c0_19 = arith.constant 0 : index
      %24 = vector.load %arg8[%c0_18, %c0_19] : memref<8x128xf32, #tpu.memory_space<vmem>>, vector<8x128xf32>
      tpu.vector_store %arg8[%c0_18, %c0_19], %23 {strides = array<i32>} : memref<8x128xf32, #tpu.memory_space<vmem>>, vector<8x128xf32>,
    } else {
    }
    %c0 = arith.constant 0 : index
    %c0_1 = arith.constant 0 : index
    %3 = vector.load %arg8[%c0, %c0_1] : memref<8x128xf32, #tpu.memory_space<vmem>>, vector<8x128xf32>
    %c0_2 = arith.constant 0 : index
    %c0_3 = arith.constant 0 : index
    %4 = vector.load %arg5[%c0_2, %c0_3] : memref<128x128xf32, #tpu.memory_space<vmem>>, vector<128x128xf32>
    %cst = arith.constant dense<0.000000e+00> : vector<8x128xf32>
    %5 = tpu.matmul %3, %4, %cst {dimension_numbers = #tpu.dot_dimension_numbers<[1], [0], [0], [1], [0, 0, 1, 1], [], []>} : vector<8x128xf32>, vector<128x128xf32>, vector<8x128xf32> -> vector<8x128xf32>
    %c0_4 = arith.constant 0 : index
    %c0_5 = arith.constant 0 : index
    %6 = vector.load %arg6[%c0_4, %c0_5] : memref<1x128xf32, #tpu.memory_space<vmem>>, vector<1x128xf32>
    %7 = vector.broadcast %6 : vector<1x128xf32> to vector<8x128xf32>
    %8 = arith.addf %5, %7 : vector<8x128xf32>
    %c0_6 = arith.constant 0 : index
    %c0_7 = arith.constant 0 : index
    %9 = vector.load %arg7[%c0_6, %c0_7] : memref<8x128xf32, #tpu.memory_space<vmem>>, vector<8x128xf32>
    tpu.vector_store %arg7[%c0_6, %c0_7], %8 {strides = array<i32>} : memref<8x128xf32, #tpu.memory_space<vmem>>, vector<8x128xf32>,
    return
  }
  func.func @transform_0(%arg0: i32, %arg1: i32) -> (i32, i32) {
    %c0_i32 = arith.constant 0 : i32
    %c0_i32_0 = arith.constant 0 : i32
    return %arg0, %c0_i32 : i32, i32
  }
  func.func @transform_1(%arg0: i32, %arg1: i32) -> (i32, i32) {
    %c0_i32 = arith.constant 0 : i32
    %c0_i32_0 = arith.constant 0 : i32
    %c0_i32_1 = arith.constant 0 : i32
    return %c0_i32, %c0_i32_0 : i32, i32
  }
  func.func @transform_2(%arg0: i32, %arg1: i32) -> (i32, i32) {
    %c0_i32 = arith.constant 0 : i32
    %c0_i32_0 = arith.constant 0 : i32
    %c0_i32_1 = arith.constant 0 : i32
    return %c0_i32, %c0_i32_0 : i32, i32
  }
  func.func @transform_3(%arg0: i32, %arg1: i32) -> (i32, i32) {
    %c0_i32 = arith.constant 0 : i32
    %c0_i32_0 = arith.constant 0 : i32
    return %c0_i32, %arg1 : i32, i32
  }
  func.func @transform_4(%arg0: i32, %arg1: i32) -> (i32, i32) {
    %c0_i32 = arith.constant 0 : i32
    %c0_i32_0 = arith.constant 0 : i32
    return %c0_i32, %arg1 : i32, i32
  }
  func.func @transform_5(%arg0: i32, %arg1: i32) -> (i32, i32) {
    %c0_i32 = arith.constant 0 : i32
    return %arg0, %arg1 : i32, i32
  }
}

</mosaic_0001>

<bundles_post_ra>
// kernel: mlp_pallas_prepared.1
= control target key start
LH: loop header
LB: loop body
LE: loop exit
PB: predicated region body
PF: predicated region fallthrough
CT: control target
= control target key end

     0   :  { %10 = vsyncpa [#allocation4], 0  ;;  %s806_s0 = inlined_call_operand.vmem [shape: f32[16,128], index: 0, kind: input, shape index: {}]   ;;  %s807_s1 = inlined_call_operand.hbm [shape: f32[128,128], index: 1, kind: input, shape index: {}]   ;;  %s808_s2 = inlined_call_operand.vmem [shape: f32[1,128], index: 2, kind: input, shape index: {}]   ;;  %s809_s3 = inlined_call_operand.hbm [shape: f32[128,128], index: 3, kind: input, shape index: {}]   ;;  %s810_s4 = inlined_call_operand.vmem [shape: f32[1,128], index: 4, kind: input, shape index: {}]   ;;  %s811_s5 = inlined_call_operand.vmem [shape: f32[16,128], index: 5, kind: output, shape index: {}]  }
   0x1   :  { %11 = vsyncpa [#allocation6], 0  ;;  %s727_s18 = smov 0   ;;  %s729_s19 = smov 0  }
   0x2   :  { %s731_s20 = smov 0  }
   0x3 LB: > { %s535_s21 = sadd.s32 4294967295, %s691_s20   ;;  %s29_s22 = sadd.s32 1, %s687_s19  ;;  %s691_s20 = sphi %s731_s20, %s17_s20   ;;  %s687_s19 = sphi %s729_s19, %s815_s19   ;;  %s683_s18 = sphi %s727_s18, %s814_s18  }
   0x4   : > { %p31_p0 = scmp.ge.s32.totalorder %s29_s22, 2  ;;  %p537_p1 = scmp.ge.s32.totalorder %s691_s20, 1 }
   0x5   : > { %p182_p2 = scmp.lt.s32.totalorder %s691_s20, 3  ;;  %p752_p4 = scmp.eq.s32.totalorder %s535_s21, 0 }
   0x6   : > { %s817_s22 = smov (%p31_p0, %s29_s22), 0  ;;  %s193_s27 = sshll.u32 %s807_s1, 4  ;;  %s194_s27 = int_to_ptr.hbm [resolvable:$true] %s193_s27 }
   0x7   : > { %p748_p3 = pnand %p537_p1, %p182_p2  ;;  %s693_s28 = smov [#allocation3]  }
   0x8   : > { %s195_s29 = sshll.u32 %s693_s28, 4  ;;  %s212_s7 = sshll.u32 %s809_s3, 4  ;;  %s196_s29 = int_to_ptr.vmem [resolvable:$true] %s195_s29  ;;  %s213_s7 = int_to_ptr.hbm [resolvable:$true] %s212_s7 }
   0x9   : > { %p558_p5 = pneg %p748_p3  ;;  %s694_s8 = smov 128  }
   0xa   : > { %s695_s9 = smov 8   ;;  %s696_s10 = smov [#allocation5]  }
   0xb   : > { %p559_p6 = pnand %p752_p4, %p558_p5  ;;  %s214_s11 = sshll.u32 %s696_s10, 4  ;;  %s215_s11 = int_to_ptr.vmem [resolvable:$true] %s214_s11 }
   0xc   : > { %243 = sbr.rel (%p748_p3) target bundleno = 360 (0x168), region = 40 }
   0xd   : > { %561 = dma.hbm_to_vmem [thread:$0]  (!%p559_p6), %s194_s27, 2048, %s196_s29, [#allocation4], %s694_s8, %s694_s8, %s695_s9  }
   0xe   : > { %564 = dma.hbm_to_vmem [thread:$0]  (!%p559_p6), %s213_s7, 2048, %s215_s11, [#allocation6], %s694_s8, %s694_s8, %s695_s9  }
  0x11   : > { %674 = dma.done.wait (%p752_p4), [#allocation4], 2048  }
  0x12   : > { %676 = vsyncadd (%p752_p4), [#allocation4], 4294965248 }
  0x13   : > { %678 = dma.done.wait (%p752_p4), [#allocation6], 2048  }
  0x14   : > { %680 = vsyncadd (%p752_p4), [#allocation6], 4294965248  ;;  %v315_v0 = vld [vmem:[#allocation3 + $0x78] sm:$0xff]  ;;  %v314_v1 = vld [vmem:[#allocation3 + $0x70] sm:$0xff]  ;;  %p281_p7 = scmp.lt.s32.totalorder %s683_s18, 1 }
  0x15   : > { %320 = vmatpush.msra.mxu0 %v315_v0  ;;  %v313_v2 = vld [vmem:[#allocation3 + $0x68] sm:$0xff]  ;;  %v312_v3 = vld [vmem:[#allocation3 + $0x60] sm:$0xff]  ;;  %v311_v4 = vld [vmem:[#allocation3 + $0x58] sm:$0xff] }
  0x16   : > { %v310_v5 = vld [vmem:[#allocation3 + $0x50] sm:$0xff]  ;;  %v309_v6 = vld [vmem:[#allocation3 + $0x48] sm:$0xff]  ;;  %v308_v7 = vld [vmem:[#allocation3 + $0x40] sm:$0xff]  ;;  %s819_s18 = smov (!%p281_p7, %s683_s18), 1 }
  0x17   : > { %321 = vmatpush.msra.mxu0 %v314_v1  ;;  %v307_v8 = vld [vmem:[#allocation3 + $0x38] sm:$0xff]  ;;  %v306_v9 = vld [vmem:[#allocation3 + $0x30] sm:$0xff]  ;;  %v305_v10 = vld [vmem:[#allocation3 + $0x28] sm:$0xff]  ;;  %s545_s12 = sshll.u32 %s819_s18, 3 }
  0x18   : > { %v304_v11 = vld [vmem:[#allocation3 + $0x20] sm:$0xff]  ;;  %v303_v12 = vld [vmem:[#allocation3 + $0x18] sm:$0xff]  ;;  %v302_v13 = vld [vmem:[#allocation3 + $0x10] sm:$0xff]  ;;  %s284_s15 = scalar_lea.vmem %s806_s0, %s545_s12  ;;  %s294_s26 = scalar_lea.vmem %s811_s5, %s545_s12 }
  0x19   : > { %322 = vmatpush.msra.mxu0 %v313_v2  ;;  %v301_v14 = vld [vmem:[#allocation3 + $0x8] sm:$0xff]  ;;  %v300_v15 = vld [vmem:[#allocation3] sm:$0xff]  ;;  %v401_v17 = vld [vmem:[#allocation5 + $0x78] sm:$0xff] }
  0x1a   : > { %v299_v16 = vld [vmem:[%s284_s15] sm:$0xff]  ;;  %406 = vmatpush.msra.mxu1 %v401_v17  ;;  %v400_v18 = vld [vmem:[#allocation5 + $0x70] sm:$0xff]  ;;  %v399_v19 = vld [vmem:[#allocation5 + $0x68] sm:$0xff] }
  0x1b   : > { %323 = vmatpush.msra.mxu0 %v312_v3  ;;  %v398_v20 = vld [vmem:[#allocation5 + $0x60] sm:$0xff]  ;;  %v397_v22 = vld [vmem:[#allocation5 + $0x58] sm:$0xff]  ;;  %v396_v23 = vld [vmem:[#allocation5 + $0x50] sm:$0xff] }
  0x1c   : > { %407 = vmatpush.msra.mxu1 %v400_v18  ;;  %v597_v21 = vld [vmem:[%s808_s2] ss:$0 sm:$0xff]  ;;  %v395_v25 = vld [vmem:[#allocation5 + $0x48] sm:$0xff]  ;;  %v393_v29 = vld [vmem:[#allocation5 + $0x38] sm:$0xff] }
  0x1d   : > { %324 = vmatpush.msra.mxu0 %v311_v4  ;;  %v394_v27 = vld [vmem:[#allocation5 + $0x40] sm:$0xff]  ;;  %v392_v31 = vld [vmem:[#allocation5 + $0x30] sm:$0xff]  ;;  %v391_v33 = vld [vmem:[#allocation5 + $0x28] sm:$0xff] }
  0x1e   : > { %408 = vmatpush.msra.mxu1 %v399_v19  ;;  %v390_v36 = vld [vmem:[#allocation5 + $0x20] sm:$0xff]  ;;  %v389_v39 = vld [vmem:[#allocation5 + $0x18] sm:$0xff]  ;;  %v388_v42 = vld [vmem:[#allocation5 + $0x10] sm:$0xff] }
  0x1f   : > { %325 = vmatpush.msra.mxu0 %v310_v5  ;;  %v387_v45 = vld [vmem:[#allocation5 + $0x8] sm:$0xff]  ;;  %v386_v47 = vld [vmem:[#allocation5] sm:$0xff] }
  0x20   : > { %409 = vmatpush.msra.mxu1 %v398_v20 }
  0x21   : > { %326 = vmatpush.msra.mxu0 %v309_v6 }
  0x22   : > { %410 = vmatpush.msra.mxu1 %v397_v22 }
  0x23   : > { %327 = vmatpush.msra.mxu0 %v308_v7 }
  0x24   : > { %411 = vmatpush.msra.mxu1 %v396_v23 }
  0x25   : > { %328 = vmatpush.msra.mxu0 %v307_v8 }
  0x26   : > { %412 = vmatpush.msra.mxu1 %v395_v25 }
  0x27   : > { %329 = vmatpush.msra.mxu0 %v306_v9 }
  0x28   : > { %413 = vmatpush.msra.mxu1 %v394_v27 }
  0x29   : > { %330 = vmatpush.msra.mxu0 %v305_v10 }
  0x2a   : > { %414 = vmatpush.msra.mxu1 %v393_v29 }
  0x2b   : > { %331 = vmatpush.msra.mxu0 %v304_v11  ;;  %v598_v11 = vld [vmem:[%s810_s4] ss:$0 sm:$0xff] }
  0x2c   : > { %415 = vmatpush.msra.mxu1 %v392_v31 }
  0x2d   : > { %332 = vmatpush.msra.mxu0 %v303_v12 }
  0x2e   : > { %416 = vmatpush.msra.mxu1 %v391_v33 }
  0x2f   : > { %333 = vmatpush.msra.mxu0 %v302_v13 }
  0x30   : > { %417 = vmatpush.msra.mxu1 %v390_v36 }
  0x31   : > { %334 = vmatpush.msra.mxu0 %v301_v14 }
  0x32   : > { %418 = vmatpush.msra.mxu1 %v389_v39 }
  0x33   : > { %335 = vmatpush.msra.mxu0 %v300_v15 }
  0x34   : > { %336 = vmatmul.f32.vlgmr.msra.gmra.mxu0 %v299_v16  ;;  %419 = vmatpush.msra.mxu1 %v388_v42 }
  0x36   : > { %420 = vmatpush.msra.mxu1 %v387_v45 }
  0x38   : > { %421 = vmatpush.msra.mxu1 %v386_v47 }
  0xb1   : > { %v337_v24 = vpop.f32.mrf.mxu0 }
  0xb2   : > { %v338_v26 = vadd.f32 %v597_v21, %v337_v24 }
  0xb4   : > { %v341_v28 = vmul.f32 0.70710677, %v338_v26  ;;  %v340_v8 = vmul.f32 0.5, %v338_v26 }
  0xb6   : > { %v342_v30 = vmul.f32 %v341_v28, %v341_v28 }
  0xb8   : > { %v343_v32 = vmin.f32 %v342_v30, 16.0 }
  0xba   : > { %v344_v34 = vmul.f32 2.1237322e-06, %v343_v32  ;;  %v355_v35 = vmul.f32 3.8918573e-05, %v343_v32 }
  0xbc   : > { %v345_v37 = vadd.f32 0.00028619796, %v344_v34  ;;  %v356_v38 = vadd.f32 0.001143296, %v355_v35 }
  0xbe   : > { %v346_v40 = vmul.f32 %v345_v37, %v343_v32  ;;  %v357_v41 = vmul.f32 %v356_v38, %v343_v32 }
  0xc0   : > { %v358_v43 = vadd.f32 0.014752088, %v357_v41  ;;  %v347_v44 = vadd.f32 0.0036580483, %v346_v40 }
  0xc2   : > { %v359_v46 = vmul.f32 %v358_v43, %v343_v32  ;;  %v348_v49 = vmul.f32 %v347_v44, %v343_v32 }
  0xc4   : > { %v360_v48 = vadd.f32 0.112945676, %v359_v46  ;;  %v349_v52 = vadd.f32 0.05243302, %v348_v49 }
  0xc6   : > { %v361_v50 = vmul.f32 %v360_v48, %v343_v32  ;;  %v350_v55 = vmul.f32 %v349_v52, %v343_v32 }
  0xc8   : > { %v362_v51 = vadd.f32 0.4994258, %v361_v50  ;;  %v351_v56 = vadd.f32 0.18741608, %v350_v55 }
  0xca   : > { %v363_v53 = vmul.f32 %v362_v51, %v343_v32  ;;  %v352_v58 = vmul.f32 %v351_v56, %v343_v32 }
  0xcc   : > { %v364_v54 = vadd.f32 1.0, %v363_v53  ;;  %v353_v62 = vadd.f32 1.1283791, %v352_v58 }
  0xce   : > { %599 = vrcp.f32 %v364_v54  ;;  %v376_v61 = vand.u32 2147483648, %v364_v54  ;;  %v374_v0 = vand.u32 2147483647, %v364_v54  ;;  %vm370_vm1 = vweird.f32 %v364_v54 }
  0xcf   : > { %v354_v3 = vmul.f32 %v353_v62, %v341_v28 }
  0xd0   : > { %v377_v2 = vor.u32 1.1754944e-38, %v376_v61  ;;  %vm375_vm3 = vcmp.eq.f32.partialorder %v374_v0, 8.507059e+37 }
  0xd4   : > { %v600_v57 = vpop.eup %599 }
  0xd5   : > { %v366_v59 = vmul.f32 %v600_v57, %v364_v54  ;;  %vm371_vm0 = vweird.f32 %v600_v57 }
  0xd6   : > { %vm372_vm2 = vmor %vm370_vm1, %vm371_vm0 }
  0xd7   : > { %v367_v60 = vsub.f32 1.0, %v366_v59 }
  0xd9   : > { %v368_v63 = vmul.f32 %v600_v57, %v367_v60 }
  0xdb   : > { %v369_v1 = vadd.f32 %v600_v57, %v368_v63 }
  0xdd   : > { %v373_v4 = vsel %vm372_vm2, %v600_v57, %v369_v1 }
  0xde   : > { %v378_v5 = vsel %vm375_vm3, %v377_v2, %v373_v4 }
  0xdf   : > { %v379_v6 = vmul.f32 %v378_v5, %v354_v3 }
  0xe1   : > { %v547_v7 = vclamps-f32 %v379_v6, 1.0 }
  0xe3   : > { %v382_v9 = vadd.f32 1.0, %v547_v7 }
  0xe5   : > { %v383_v10 = vmul.f32 %v382_v9, %v340_v8 }
  0xe7   : > { %422 = vmatmul.f32.vlgmr.msra.gmra.mxu1 %v383_v10 }
 0x164   : > { %v423_v12 = vpop.f32.mrf.mxu1 }
 0x165   : > { %v424_v13 = vadd.f32 %v598_v11, %v423_v12 }
 0x167   : > { %426 = vst [vmem:[%s294_s26] sm:$0xff] %v424_v13 }
 0x168 PF: > { %s17_s20 = sadd.s32 1, %s691_s20   ;;  %s814_s18 = smov %s687_s19 }
 0x169   : > { %p14_p8 = scmp.ge.s32.totalorder %s17_s20, 4   ;;  %s815_s19 = smov %s817_s22 }
 0x16b   :  { %16 = sbr.rel (!%p14_p8) target bundleno = 3 (0x3), region = 87 }
 0x170   :  { %452 = vsyncpa [#allocation4], 1 }
 0x171   :  { %454 = vsyncpa [#allocation4 + $0x1], 1 }
 0x172   :  { %455 = vsyncpa [#allocation6], 1 }

</bundles_post_ra>
